<compile_context>
chip_gen: v7x
topology: tpu7x:2x2x1
jax: 0.10.0
libtpu: 0.0.40
codegen_flags: <defaults>
</compile_context>

<pallas_src>
import functools

import jax
import jax.numpy as jnp
from jax.experimental import pallas as pl
from jax.experimental.pallas import tpu as pltpu

_LANE = 128                      # hidden feature dims padded to this
_FLAT_MAX = 1024                 # batches up to this take the grid-free path
_BLOCK_M = 1024                  # batch tile for the gridded path
_VMEM_LIMIT = 32 * 1024 * 1024   # explicit scoped-VMEM cap (v5e default is 16 MiB)


def _round_up(x, m):
    return ((x + m - 1) // m) * m


# --------------------------------------------------------------------------
# Fused MLP kernel (whole network in one pallas_call)
# --------------------------------------------------------------------------
def _mlp_kernel(*refs, activations):
    """Fused MLP forward for one batch tile.

    refs = (x_ref, w0, b0, w1, b1, ..., o_ref)
      x_ref: [Mblk, n_inputs]          (last dim unpadded)
      wi:    [K_i, N_i]   bi: [1, N_i] (hidden dims 128-padded, first K and
                                        last N unpadded)
      o_ref: [Mblk, n_outputs]         (last dim unpadded)

    Padded hidden lanes stay exactly zero through tanh/relu (bias pad is
    zero), so they never leak into real lanes.
    """
    x_ref = refs[0]
    o_ref = refs[-1]
    wb = refs[1:-1]

    y = x_ref[...].astype(jnp.float32)
    for li, act in enumerate(activations):
        w = wb[2 * li][...]
        b = wb[2 * li + 1][...]
        y = jnp.dot(y, w, preferred_element_type=jnp.float32) + b
        if act == "tanh":
            y = jnp.tanh(y)
        elif act == "relu":
            y = jnp.maximum(y, 0.0)
    o_ref[...] = y.astype(o_ref.dtype)


def fused_mlp(x, params, activations, *, flat_max=_FLAT_MAX, block_m=_BLOCK_M):
    """Single pallas_call computing the whole MLP.

    x:      [M, n_inputs]  (unpadded)
    params: list of (W [K_i, N_i], b [1, N_i]); hidden dims 128-aligned,
            first in-dim and last out-dim unpadded.
    """
    M, K = x.shape
    n_out = params[-1][0].shape[1]

    flat = []
    for w, b in params:
        flat.extend((w, b))

    kernel = functools.partial(_mlp_kernel, activations=tuple(activations))

    # Advisory cost estimate so XLA schedules the custom call sensibly.
    flops = 0
    trans = 0
    nbytes = (x.size + M * n_out) * 4
    for (w, b), a in zip(params, activations):
        flops += 2 * M * w.shape[0] * w.shape[1]
        nbytes += (w.size + b.size) * 4
        if a == "tanh":
            trans += M * w.shape[1]
    ce = pl.CostEstimate(flops=flops, transcendentals=trans,
                         bytes_accessed=nbytes)

    out_shape = jax.ShapeDtypeStruct((M, n_out), jnp.float32)

    if M <= flat_max:
        # Flat, grid-free call: everything fits in VMEM, one DMA per array,
        # no per-step pipeline overhead (v5e/v6e have a single TensorCore, so
        # a grid here would be a pure-overhead serial loop).
        n_in = 1 + len(flat)
        return pl.pallas_call(
            kernel,
            out_shape=out_shape,
            in_specs=[pl.BlockSpec(memory_space=pltpu.MemorySpace.VMEM)] * n_in,
            out_specs=pl.BlockSpec(memory_space=pltpu.MemorySpace.VMEM),
            compiler_params=pltpu.CompilerParams(
                vmem_limit_bytes=_VMEM_LIMIT),
            cost_estimate=ce,
        )(x, *flat)

    # Large batch: tile rows with grid = cdiv(M, block_m); the last block may
    # be ragged (Pallas masks the out-of-bounds store, and rows are
    # independent so padded input rows cannot contaminate valid rows).
    # Weights/biases use a constant index_map so they are fetched once and
    # stay VMEM-resident; the batch axis is "parallel" so v7x can shard the
    # tiles across both TensorCores (no-op on v5e/v6e).
    grid = (pl.cdiv(M, block_m),)
    in_specs = [pl.BlockSpec((block_m, K), lambda i: (i, 0))]
    for w, b in params:
        in_specs.append(pl.BlockSpec(w.shape, lambda i: (0, 0)))
        in_specs.append(pl.BlockSpec(b.shape, lambda i: (0, 0)))
    return pl.pallas_call(
        kernel,
        out_shape=out_shape,
        grid=grid,
        in_specs=in_specs,
        out_specs=pl.BlockSpec((block_m, n_out), lambda i: (i, 0)),
        compiler_params=pltpu.CompilerParams(
            dimension_semantics=("parallel",),
            vmem_limit_bytes=_VMEM_LIMIT),
        cost_estimate=ce,
    )(x, *flat)


# --------------------------------------------------------------------------
# Model wrapper
# --------------------------------------------------------------------------
def _init_linear(key, fan_in, fan_out):
    """Deterministic init mimicking torch.nn.Linear defaults (uniform +-1/sqrt(fan_in))."""
    kw, kb = jax.random.split(key)
    bound = 1.0 / float(fan_in) ** 0.5
    w = jax.random.uniform(kw, (fan_in, fan_out), jnp.float32, -bound, bound)
    b = jax.random.uniform(kb, (1, fan_out), jnp.float32, -bound, bound)
    return w, b


class PallasNN:
    """Pallas/JAX equivalent of PyTorchNN's forward pass (fused single kernel)."""

    def __init__(self, n_inputs, network, n_outputs, relu=False, *, key):
        act = "relu" if relu else "tanh"
        dims = [n_inputs] + list(network) + [n_outputs]

        # Activation after each Linear (None = no activation).  This matches
        # PyTorchNN's Sequential construction exactly: activations are only
        # inserted inside the `if len(network) > 1:` branch, so a single
        # hidden layer yields two Linears with no activation at all, and the
        # output Linear never has an activation.
        acts = [act if len(network) > 1 else None]
        acts += [act] * (len(network) - 1)
        acts.append(None)
        assert len(acts) == len(dims) - 1

        # Lane-pad only the *internal* (hidden) feature dims to 128.  The
        # kernel input keeps K = n_inputs and the kernel output keeps
        # N = n_outputs, so there is no host-side pad of X and no padded
        # output writeback.
        dims_p = list(dims)
        for j in range(1, len(dims) - 1):
            dims_p[j] = _round_up(dims[j], _LANE)

        self.dims = dims
        self.dims_p = dims_p
        self.activations = acts
        self.n_outputs = n_outputs

        keys = jax.random.split(key, len(acts))
        self.params_raw = []   # unpadded (reference / export)
        self.params = []       # hidden dims zero-padded to 128-lane multiples
        for j, k in enumerate(keys):
            fan_in, fan_out = dims[j], dims[j + 1]
            w, b = _init_linear(k, fan_in, fan_out)
            self.params_raw.append((w, b))
            wp = jnp.zeros((dims_p[j], dims_p[j + 1]), jnp.float32)
            wp = wp.at[:fan_in, :fan_out].set(w)
            bp = jnp.zeros((1, dims_p[j + 1]), jnp.float32)
            bp = bp.at[:, :fan_out].set(b)
            self.params.append((wp, bp))

        # As in the PyTorch source, these are never used by forward().
        self.Xmeans = None
        self.Tmeans = None
        # TODO(synk): train_pytorch (Adam/SGD training loop) and use_pytorch
        # are host-side optimizer / numpy-export logic, not kernels; only the
        # forward pass is implemented here.

    def forward(self, X):
        M, K = X.shape
        assert K == self.dims[0], (K, self.dims[0])
        return fused_mlp(X.astype(jnp.float32), self.params, self.activations)

    __call__ = forward


def _reference_forward(model, X):
    """Pure-jnp reference (unpadded params) for correctness checks."""
    y = X.astype(jnp.float32)
    for (w, b), a in zip(model.params_raw, model.activations):
        y = y @ w + b
        if a == "tanh":
            y = jnp.tanh(y)
        elif a == "relu":
            y = jnp.maximum(y, 0.0)
    return y


if __name__ == "__main__":
    key = jax.random.PRNGKey(0)
    k_params, k_params2, k_x, k_xm, k_xb = jax.random.split(key, 5)

    # --- small-batch case (flat, grid-free fused kernel) ------------------
    batch = 8
    n_inputs = 32
    network = [64, 48]       # two hidden layers -> Tanh after each hidden Linear
    n_outputs = 16

    model = PallasNN(n_inputs, network, n_outputs, relu=False, key=k_params)
    X = jax.random.normal(k_x, (batch, n_inputs), dtype=jnp.float32)

    out = jax.block_until_ready(model(X))
    ref = _reference_forward(model, X)
    assert out.shape == (batch, n_outputs), out.shape
    assert jnp.allclose(out, ref, atol=1e-4, rtol=1e-4), "small-batch mismatch"

    # --- single-hidden-layer case (no activation anywhere), ReLU flag -----
    model1 = PallasNN(24, [40], 10, relu=True, key=k_params2)
    X1 = jax.random.normal(k_x, (5, 24), dtype=jnp.float32)
    out1 = jax.block_until_ready(model1(X1))
    ref1 = _reference_forward(model1, X1)
    assert out1.shape == (5, 10)
    assert jnp.allclose(out1, ref1, atol=1e-4, rtol=1e-4), "1-hidden mismatch"

    # --- mid-size batch: still the flat (grid-free) path ------------------
    Xm = jax.random.normal(k_xm, (512, n_inputs), dtype=jnp.float32)
    outm = jax.block_until_ready(model(Xm))
    refm = _reference_forward(model, Xm)
    assert outm.shape == (512, n_outputs)
    assert jnp.allclose(outm, refm, atol=1e-4, rtol=1e-4), "mid-batch mismatch"

    # --- large ragged batch: gridded path, ragged last block --------------
    Xb = jax.random.normal(k_xb, (2300, n_inputs), dtype=jnp.float32)
    outb = jax.block_until_ready(model(Xb))
    refb = _reference_forward(model, Xb)
    assert outb.shape == (2300, n_outputs)
    assert jnp.allclose(outb, refb, atol=1e-4, rtol=1e-4), "batched mismatch"

    print("KERNEL_OK")
</pallas_src>

<mosaic_0001>
module attributes {stable_mosaic.version = 11 : i64} {
  func.func @_mlp_kernel(%arg0: memref<8x32xf32, #tpu.memory_space<vmem>>, %arg1: memref<32x128xf32, #tpu.memory_space<vmem>>, %arg2: memref<1x128xf32, #tpu.memory_space<vmem>>, %arg3: memref<128x128xf32, #tpu.memory_space<vmem>>, %arg4: memref<1x128xf32, #tpu.memory_space<vmem>>, %arg5: memref<128x16xf32, #tpu.memory_space<vmem>>, %arg6: memref<1x16xf32, #tpu.memory_space<vmem>>, %arg7: memref<8x16xf32, #tpu.memory_space<vmem>>) attributes {dimension_semantics = [], scalar_prefetch = 0 : i64, scratch_operands = 0 : i64, tpu.core_type = #tpu.core_type<tc>} {
    %c0 = arith.constant 0 : index
    %c0_0 = arith.constant 0 : index
    %0 = vector.load %arg0[%c0, %c0_0] : memref<8x32xf32, #tpu.memory_space<vmem>>, vector<8x32xf32>
    %c0_1 = arith.constant 0 : index
    %c0_2 = arith.constant 0 : index
    %1 = vector.load %arg1[%c0_1, %c0_2] : memref<32x128xf32, #tpu.memory_space<vmem>>, vector<32x128xf32>
    %c0_3 = arith.constant 0 : index
    %c0_4 = arith.constant 0 : index
    %2 = vector.load %arg2[%c0_3, %c0_4] : memref<1x128xf32, #tpu.memory_space<vmem>>, vector<1x128xf32>
    %cst = arith.constant dense<0.000000e+00> : vector<8x128xf32>
    %3 = tpu.matmul %0, %1, %cst {dimension_numbers = #tpu.dot_dimension_numbers<[1], [0], [0], [1], [0, 0, 1, 1], [], []>} : vector<8x32xf32>, vector<32x128xf32>, vector<8x128xf32> -> vector<8x128xf32>
    %4 = vector.broadcast %2 : vector<1x128xf32> to vector<8x128xf32>
    %5 = arith.addf %3, %4 : vector<8x128xf32>
    %6 = math.tanh %5 : vector<8x128xf32>
    %c0_5 = arith.constant 0 : index
    %c0_6 = arith.constant 0 : index
    %7 = vector.load %arg3[%c0_5, %c0_6] : memref<128x128xf32, #tpu.memory_space<vmem>>, vector<128x128xf32>
    %c0_7 = arith.constant 0 : index
    %c0_8 = arith.constant 0 : index
    %8 = vector.load %arg4[%c0_7, %c0_8] : memref<1x128xf32, #tpu.memory_space<vmem>>, vector<1x128xf32>
    %cst_9 = arith.constant dense<0.000000e+00> : vector<8x128xf32>
    %9 = tpu.matmul %6, %7, %cst_9 {dimension_numbers = #tpu.dot_dimension_numbers<[1], [0], [0], [1], [0, 0, 1, 1], [], []>} : vector<8x128xf32>, vector<128x128xf32>, vector<8x128xf32> -> vector<8x128xf32>
    %10 = vector.broadcast %8 : vector<1x128xf32> to vector<8x128xf32>
    %11 = arith.addf %9, %10 : vector<8x128xf32>
    %12 = math.tanh %11 : vector<8x128xf32>
    %c0_10 = arith.constant 0 : index
    %c0_11 = arith.constant 0 : index
    %13 = vector.load %arg5[%c0_10, %c0_11] : memref<128x16xf32, #tpu.memory_space<vmem>>, vector<128x16xf32>
    %c0_12 = arith.constant 0 : index
    %c0_13 = arith.constant 0 : index
    %14 = vector.load %arg6[%c0_12, %c0_13] : memref<1x16xf32, #tpu.memory_space<vmem>>, vector<1x16xf32>
    %cst_14 = arith.constant dense<0.000000e+00> : vector<8x16xf32>
    %15 = tpu.matmul %12, %13, %cst_14 {dimension_numbers = #tpu.dot_dimension_numbers<[1], [0], [0], [1], [0, 0, 1, 1], [], []>} : vector<8x128xf32>, vector<128x16xf32>, vector<8x16xf32> -> vector<8x16xf32>
    %16 = vector.broadcast %14 : vector<1x16xf32> to vector<8x16xf32>
    %17 = arith.addf %15, %16 : vector<8x16xf32>
    %c0_15 = arith.constant 0 : index
    %c0_16 = arith.constant 0 : index
    %18 = vector.load %arg7[%c0_15, %c0_16] : memref<8x16xf32, #tpu.memory_space<vmem>>, vector<8x16xf32>
    tpu.vector_store %arg7[%c0_15, %c0_16], %17 {strides = array<i32>} : memref<8x16xf32, #tpu.memory_space<vmem>>, vector<8x16xf32>,
    return
  }
}

</mosaic_0001>

<bundles_post_ra>
// kernel: tpu_custom_call.1
= control target key start
LH: loop header
LB: loop body
LE: loop exit
PB: predicated region body
PF: predicated region fallthrough
CT: control target
= control target key end

     0   :  { %12 = vsyncpa [#allocation3], 0  ;;  %s769_s0 = inlined_call_operand.vmem [shape: f32[8,32], index: 0, kind: input, shape index: {}]   ;;  %s770_s1 = inlined_call_operand.hbm [shape: f32[32,128], index: 1, kind: input, shape index: {}]   ;;  %s771_s2 = inlined_call_operand.vmem [shape: f32[1,128], index: 2, kind: input, shape index: {}]   ;;  %s772_s3 = inlined_call_operand.vmem [shape: f32[128,128], index: 3, kind: input, shape index: {}]   ;;  %s773_s4 = inlined_call_operand.vmem [shape: f32[1,128], index: 4, kind: input, shape index: {}]   ;;  %s774_s5 = inlined_call_operand.vmem [shape: f32[128,16], index: 5, kind: input, shape index: {}]   ;;  %s775_s6 = inlined_call_operand.vmem [shape: f32[1,16], index: 6, kind: input, shape index: {}]   ;;  %s776_s7 = inlined_call_operand.hbm [shape: f32[8,16], index: 7, kind: output, shape index: {}]  }
   0x1   :  { %13 = vsyncpa [#allocation4], 0  ;;  %s569_s24 = smov [#allocation2]   ;;  %s521_s28 = scalar_lea.hbm %s770_s1, 512 }
   0x2   :  { %s21_s25 = sshll.u32 %s569_s24, 4  ;;  %p522_p0 = scmp.ne.s32.totalorder %s770_s1, %s521_s28  ;;  %s22_s25 = int_to_ptr.vmem [resolvable:$true] %s21_s25 }
   0x3   :  { %p525_p1 = scmp.lt.u32.totalorder %s521_s28, %s770_s1 }
   0x5   :  { %p527_p2 = pnand %p525_p1, %p522_p0 }
   0x7   :  { %530 = shalt.err (!%p527_p2)
}
   0x8   :  { %s531_s10 = scalar_lea.vmem %s22_s25, 512  ;;  %p536_p4 = scmp.lt.s32.totalorder %s22_s25, %s22_s25 }
   0x9   :  { %p532_p3 = scmp.ne.s32.totalorder %s22_s25, %s531_s10  ;;  %p537_p5 = scmp.lt.s32.totalorder %s531_s10, %s531_s10 }
   0xb   :  { %p538_p6 = por %p537_p5, %p536_p4 }
   0xd   :  { %p539_p7 = pnand %p538_p6, %p532_p3 }
   0xf   :  { %542 = shalt.err (!%p539_p7)
}
  0x10   :  { %s570_s11 = smov 128   ;;  %s571_s12 = smov 8  }
  0x11   :  { %27 = dma.hbm_to_vmem [thread:$0]  %s770_s1, 512, %s22_s25, [#allocation3], %s570_s11, %s570_s11, %s571_s12  }
  0x12   :  { %565 = dma.done.wait [#allocation3], 512  }
  0x13   :  { %566 = vsyncadd [#allocation3], 4294966784  ;;  %v572_v0 = vmov 0.0|0.0   ;;  %vm573_vm0 = vmmov 0   ;;  %v574_v1 = vmov 0.0   ;;  %v42_v2 = vld [vmem:[#allocation2] sm:$0xff] }
  0x14   :  { %456 = vmatprep.subr.bf16.mxu0 %v572_v0  ;;  %383 = vmatprep.mubr.msk.f32.mxu0 %vm573_vm0, %v574_v1  ;;  %v43_v3 = vld [vmem:[#allocation2 + $0x8] sm:$0xff]  ;;  %v44_v4 = vld [vmem:[#allocation2 + $0x10] sm:$0xff]  ;;  %v45_v6 = vld [vmem:[#allocation2 + $0x18] sm:$0xff]  ;;  %vm53_vm1 = vcmask 261120   ;;  %vm315_vm2 = vcmask 130048  }
  0x15   :  { %462 = vmatprep.subr.bf16.mxu1 %v572_v0  ;;  %418 = vmatprep.mubr.msk.f32.mxu1 %vm573_vm0, %v574_v1  ;;  %v457_v5 = vpack.c.bf16 %v43_v3, %v42_v2  ;;  %v128_v7 = vld [vmem:[%s772_s3] sm:$0xff]  ;;  %v129_v8 = vld [vmem:[%s772_s3 + $0x8] sm:$0xff]  ;;  %v130_v9 = vld [vmem:[%s772_s3 + $0x10] sm:$0xff]  ;;  %v460_v11 = vpack.c.bf16 %v45_v6, %v44_v4 }
  0x16   :  { %v131_v10 = vld [vmem:[%s772_s3 + $0x18] sm:$0xff]  ;;  %v463_v12 = vpack.c.bf16 %v129_v8, %v128_v7  ;;  %v132_v14 = vld [vmem:[%s772_s3 + $0x20] sm:$0xff]  ;;  %v133_v15 = vld [vmem:[%s772_s3 + $0x28] sm:$0xff] }
  0x17   :  { %458 = vmatpush3.bf16.msra.mxu0 %v457_v5  ;;  %v466_v13 = vpack.c.bf16 %v131_v10, %v130_v9  ;;  %v41_v16 = vld [vmem:[%s769_s0] sm:$0xff]  ;;  %v469_v17 = vpack.c.bf16 %v133_v15, %v132_v14  ;;  %v134_v18 = vld [vmem:[%s772_s3 + $0x30] sm:$0xff]  ;;  %v135_v19 = vld [vmem:[%s772_s3 + $0x38] sm:$0xff] }
  0x18   :  { %459 = vmatprep.subr.bf16.mxu0 %v572_v0  ;;  %464 = vmatpush3.bf16.msra.mxu1 %v463_v12  ;;  %v472_v20 = vpack.c.bf16 %v135_v19, %v134_v18  ;;  %v136_v21 = vld [vmem:[%s772_s3 + $0x40] sm:$0xff]  ;;  %v137_v22 = vld [vmem:[%s772_s3 + $0x48] sm:$0xff]  ;;  %v138_v24 = vld [vmem:[%s772_s3 + $0x50] sm:$0xff] }
  0x19   :  { %465 = vmatprep.subr.bf16.mxu1 %v572_v0  ;;  %v475_v23 = vpack.c.bf16 %v137_v22, %v136_v21  ;;  %v139_v25 = vld [vmem:[%s772_s3 + $0x58] sm:$0xff]  ;;  %v140_v27 = vld [vmem:[%s772_s3 + $0x60] sm:$0xff]  ;;  %v141_v28 = vld [vmem:[%s772_s3 + $0x68] sm:$0xff] }
  0x1a   :  { %v478_v26 = vpack.c.bf16 %v139_v25, %v138_v24  ;;  %v481_v29 = vpack.c.bf16 %v141_v28, %v140_v27  ;;  %v142_v30 = vld [vmem:[%s772_s3 + $0x70] sm:$0xff]  ;;  %v143_v31 = vld [vmem:[%s772_s3 + $0x78] sm:$0xff]  ;;  %v222_v33 = vld [vmem:[%s774_s5] sm:$0xff] }
  0x1b   :  { %461 = vmatpush3.bf16.msra.mxu0 %v460_v11  ;;  %v484_v32 = vpack.c.bf16 %v143_v31, %v142_v30  ;;  %v223_v34 = vld [vmem:[%s774_s5 + $0x8] sm:$0xff]  ;;  %v224_v35 = vld [vmem:[%s774_s5 + $0x10] sm:$0xff]  ;;  %v225_v37 = vld [vmem:[%s774_s5 + $0x18] sm:$0xff] }
  0x1c   :  { %486 = vmatprep.subr.bf16.mxu0 %v572_v0  ;;  %467 = vmatpush3.bf16.msra.mxu1 %v466_v13  ;;  %v487_v36 = vpack.c.bf16 %v223_v34, %v222_v33  ;;  %v490_v38 = vpack.c.bf16 %v225_v37, %v224_v35  ;;  %v226_v39 = vld [vmem:[%s774_s5 + $0x20] sm:$0xff]  ;;  %v227_v40 = vld [vmem:[%s774_s5 + $0x28] sm:$0xff]  ;;  %v228_v42 = vld [vmem:[%s774_s5 + $0x30] sm:$0xff] }
  0x1d   :  { %468 = vmatprep.subr.bf16.mxu1 %v572_v0  ;;  %v493_v41 = vpack.c.bf16 %v227_v40, %v226_v39  ;;  %v229_v43 = vld [vmem:[%s774_s5 + $0x38] sm:$0xff]  ;;  %v230_v45 = vld [vmem:[%s774_s5 + $0x40] sm:$0xff]  ;;  %v231_v46 = vld [vmem:[%s774_s5 + $0x48] sm:$0xff] }
  0x1e   :  { %384 = vmatmul.mubr.msk.f32.vlgmr.msra.gmra.mrb[0].mxu0 %vm53_vm1, %v41_v16  ;;  %v496_v44 = vpack.c.bf16 %v229_v43, %v228_v42  ;;  %v499_v47 = vpack.c.bf16 %v231_v46, %v230_v45  ;;  %v332_v48 = vld [vmem:[%s771_s2] ss:$0 sm:$0xff]  ;;  %v232_v53 = vld [vmem:[%s774_s5 + $0x50] sm:$0xff]  ;;  %v233_v54 = vld [vmem:[%s774_s5 + $0x58] sm:$0xff] }
  0x1f   :  { %453 = vmatprep.mubr.msk.f32.mxu0 %vm573_vm0, %v574_v1  ;;  %488 = vmatpush3.bf16.msra.mxu0 %v487_v36  ;;  %v502_v55 = vpack.c.bf16 %v233_v54, %v232_v53  ;;  %v234_v56 = vld [vmem:[%s774_s5 + $0x60] sm:$0xff]  ;;  %v235_v57 = vld [vmem:[%s774_s5 + $0x68] sm:$0xff]  ;;  %v236_v59 = vld [vmem:[%s774_s5 + $0x70] sm:$0xff] }
  0x20   :  { %470 = vmatpush3.bf16.msra.mxu1 %v469_v17  ;;  %489 = vmatprep.subr.bf16.mxu0 %v572_v0  ;;  %v505_v58 = vpack.c.bf16 %v235_v57, %v234_v56  ;;  %v237_v60 = vld [vmem:[%s774_s5 + $0x78] sm:$0xff]  ;;  %v334_v62 = vld [vmem:[%s773_s4] ss:$0 sm:$0xff]  ;;  %s575_s5 = smov [#allocation5]  }
  0x21   :  { %471 = vmatprep.subr.bf16.mxu1 %v572_v0  ;;  %v508_v61 = vpack.c.bf16 %v237_v60, %v236_v59  ;;  %v335_v4 = vld [vmem:[%s775_s6] ss:$0 sm:$0xff]  ;;  %s323_s9 = sshll.u32 %s575_s5, 4  ;;  %s324_s9 = int_to_ptr.vmem [resolvable:$true] %s323_s9 }
  0x22   :  { %s543_s10 = scalar_lea.vmem %s324_s9, 128  ;;  %p548_p9 = scmp.lt.s32.totalorder %s324_s9, %s324_s9 }
  0x23   :  { %491 = vmatpush3.bf16.msra.mxu0 %v490_v38  ;;  %p544_p8 = scmp.ne.s32.totalorder %s324_s9, %s543_s10  ;;  %p549_p10 = scmp.lt.s32.totalorder %s543_s10, %s543_s10 }
  0x24   :  { %473 = vmatpush3.bf16.msra.mxu1 %v472_v20  ;;  %492 = vmatprep.subr.bf16.mxu0 %v572_v0 }
  0x25   :  { %474 = vmatprep.subr.bf16.mxu1 %v572_v0  ;;  %p550_p11 = por %p549_p10, %p548_p9 }
  0x27   :  { %494 = vmatpush3.bf16.msra.mxu0 %v493_v41  ;;  %p551_p12 = pnand %p550_p11, %p544_p8 }
  0x28   :  { %476 = vmatpush3.bf16.msra.mxu1 %v475_v23  ;;  %495 = vmatprep.subr.bf16.mxu0 %v572_v0 }
  0x29   :  { %477 = vmatprep.subr.bf16.mxu1 %v572_v0 }
  0x2b   :  { %497 = vmatpush3.bf16.msra.mxu0 %v496_v44 }
  0x2c   :  { %479 = vmatpush3.bf16.msra.mxu1 %v478_v26  ;;  %498 = vmatprep.subr.bf16.mxu0 %v572_v0 }
  0x2d   :  { %480 = vmatprep.subr.bf16.mxu1 %v572_v0 }
  0x2f   :  { %500 = vmatpush3.bf16.msra.mxu0 %v499_v47 }
  0x30   :  { %482 = vmatpush3.bf16.msra.mxu1 %v481_v29  ;;  %501 = vmatprep.subr.bf16.mxu0 %v572_v0 }
  0x31   :  { %483 = vmatprep.subr.bf16.mxu1 %v572_v0 }
  0x33   :  { %503 = vmatpush3.bf16.msra.mxu0 %v502_v55 }
  0x34   :  { %485 = vmatpush3.bf16.msra.mxu1 %v484_v32  ;;  %504 = vmatprep.subr.bf16.mxu0 %v572_v0 }
  0x37   :  { %506 = vmatpush3.bf16.msra.mxu0 %v505_v58 }
  0x38   :  { %507 = vmatprep.subr.bf16.mxu0 %v572_v0 }
  0x3b   :  { %509 = vmatpush3.bf16.msra.mxu0 %v508_v61 }
  0xf1   :  { %v123_v49 = vpop.f32.mrb[0].mxu0 }
  0xf2   :  { %v124_v50 = vadd.f32 %v332_v48, %v123_v49  ;;  %v385_v51 = vpop.f32.mrb[1].mxu0 }
  0xf4   :  { %517 = vtanh.f32 %v124_v50 }
  0xfe   :  { %v518_v52 = vpop.eup %517 }
  0xff   :  { %419 = vmatmul.mubr.f32.vlgmr.msra.gmra.mrb[0].mxu1 %v518_v52 }
 0x1d2   :  { %v217_v63 = vpop.f32.mrb[0].mxu1 }
 0x1d3   :  { %v218_v1 = vadd.f32 %v334_v62, %v217_v63  ;;  %v420_v2 = vpop.f32.mrb[1].mxu1 }
 0x1d5   :  { %519 = vtanh.f32 %v218_v1 }
 0x1df   :  { %v520_v3 = vpop.eup %519 }
 0x1e0   :  { %454 = vmatmul.mubr.f32.vlgmr.msra.gmra.mrb[2].mxu0 %v520_v3 }
 0x2b3   :  { %v311_v5 = vpop.f32.mrb[2].mxu0 }
 0x2b4   :  { %v312_v0 = vadd.f32 %v335_v4, %v311_v5  ;;  %v455_v6 = vpop.f32.mrb[3].mxu0 }
 0x2b6   :  { %316 = vst.msk [vmem:[#allocation5] sm:$0xff] %vm315_vm2, %v312_v0 }
 0x2b7   :  { %554 = shalt.err (!%p551_p12)
}
 0x2b8   :  { %s555_s12 = scalar_lea.hbm %s776_s7, 128 }
 0x2b9   :  { %p556_p13 = scmp.ne.s32.totalorder %s776_s7, %s555_s12  ;;  %p559_p0 = scmp.lt.u32.totalorder %s555_s12, %s776_s7 }
 0x2bb   :  { %p561_p1 = pnand %p559_p0, %p556_p13 }
 0x2bd   :  { %564 = shalt.err (!%p561_p1)
}
 0x2be   :  { %326 = dma.vmem_to_hbm [thread:$0]  %s324_s9, 128, %s776_s7, [#allocation4]  }
 0x2bf   :  { %567 = dma.done.wait [#allocation4], 128  }
 0x2c0   :  { %568 = vsyncadd [#allocation4], 4294967168 }
 0x2c1   :  { %330 = vsyncpa [#allocation3], 1 }
 0x2c2   :  { %331 = vsyncpa [#allocation4], 1 }

</bundles_post_ra>
